<compile_context>
chip_gen: v6e
topology: v6e:2x2x1
jax: 0.10.0
libtpu: 0.0.40
codegen_flags: <defaults>
</compile_context>

<pallas_src>
import math

import jax
import jax.numpy as jnp
from jax.experimental import pallas as pl
from jax.experimental.pallas import tpu as pltpu


def _round_up(x, m):
    return ((x + m - 1) // m) * m


def _pick_tile(requested, dim, align=128):
    """Largest tile <= requested that is a multiple of `align` and divides `dim`.

    Falls back to the full dim when dim is small / not 128-aligned.
    """
    if dim <= align:
        return dim
    t = min(requested, dim)
    t = (t // align) * align
    while t > align and dim % t != 0:
        t -= align
    if t < align or dim % t != 0:
        return dim
    return t


def _linear_kernel(x_ref, w_ref, b_ref, o_ref, acc_ref):
    # x_ref: (tm, tk)   w_ref: (tk, tn)   b_ref: (1, tn)
    # o_ref: (tm, tn)   acc_ref: VMEM (tm, tn) f32 accumulator
    k = pl.program_id(2)

    @pl.when(k == 0)
    def _():
        acc_ref[...] = jnp.zeros_like(acc_ref)

    acc_ref[...] += jnp.dot(
        x_ref[...], w_ref[...], preferred_element_type=jnp.float32
    )

    @pl.when(k == pl.num_programs(2) - 1)
    def _():
        o_ref[...] = (acc_ref[...] + b_ref[...].astype(jnp.float32)).astype(
            o_ref.dtype
        )


def big_linear_projection(
    x,
    w_kn,
    bias,
    *,
    tm=256,
    tn=256,
    tk=512,
    compute_dtype=None,
    vmem_limit_bytes=48 * 1024 * 1024,
):
    """Linear layer y = x @ W^T + b.

    Args:
      x:    [..., K] input.
      w_kn: (K, N) weight in (in, out) layout. Transpose the PyTorch (out, in)
            weight ONCE at parameter-load time, not per forward call.
      bias: (N,) bias.
      tm/tn/tk: tile sizes (clamped to the problem size; tn/tk kept as
            multiples of 128 when possible).
      compute_dtype: optionally cast x and W (e.g. jnp.bfloat16) for the MXU;
            accumulation is always f32.
    """
    K, N = w_kn.shape
    orig_shape = x.shape
    orig_dtype = x.dtype
    x2d = x.reshape(-1, K)
    M = x2d.shape[0]

    if compute_dtype is not None:
        # TODO(synk): for production, cast W to compute_dtype once at
        # parameter-load time instead of per call.
        x2d = x2d.astype(compute_dtype)
        w_kn = w_kn.astype(compute_dtype)

    # Clamp tiles to the problem, keep lane/sublane alignment.
    tm = _round_up(min(tm, _round_up(M, 8)), 8)
    tn = _pick_tile(tn, N, 128)
    tk = _pick_tile(tk, K, 128)

    # Pad M to a tile multiple (no assert); slice the pad off at the end.
    Mp = _round_up(M, tm)
    if Mp != M:
        x2d = jnp.pad(x2d, ((0, Mp - M), (0, 0)))

    b2d = bias.reshape(1, N)

    grid = (Mp // tm, N // tn, K // tk)

    bytes_accessed = (
        x2d.size * x2d.dtype.itemsize
        + w_kn.size * w_kn.dtype.itemsize
        + b2d.size * b2d.dtype.itemsize
        + Mp * N * jnp.dtype(orig_dtype).itemsize
    )
    cost = pl.CostEstimate(
        flops=2 * Mp * K * N, transcendentals=0, bytes_accessed=bytes_accessed
    )

    out = pl.pallas_call(
        _linear_kernel,
        out_shape=jax.ShapeDtypeStruct((Mp, N), orig_dtype),
        grid_spec=pltpu.PrefetchScalarGridSpec(
            num_scalar_prefetch=0,
            grid=grid,
            in_specs=[
                pl.BlockSpec((tm, tk), lambda i, j, k: (i, k)),  # x tile
                pl.BlockSpec((tk, tn), lambda i, j, k: (k, j)),  # weight tile
                pl.BlockSpec((1, tn), lambda i, j, k: (0, j)),   # bias tile
            ],
            out_specs=pl.BlockSpec((tm, tn), lambda i, j, k: (i, j)),
            scratch_shapes=[pltpu.VMEM((tm, tn), jnp.float32)],
        ),
        compiler_params=pltpu.CompilerParams(
            dimension_semantics=("parallel", "parallel", "arbitrary"),
            vmem_limit_bytes=vmem_limit_bytes,
        ),
        cost_estimate=cost,
    )(x2d, w_kn, b2d)

    if Mp != M:
        out = out[:M]
    return out.reshape(orig_shape)


if __name__ == "__main__":
    key = jax.random.PRNGKey(0)
    k_x, k_w, k_b = jax.random.split(key, 3)

    # Small shapes consistent with the module; seq chosen so batch*seq is NOT a
    # tile multiple (exercises the padding path).
    batch, seq, big_model_dim = 2, 50, 256

    # Synthetic nn.Linear parameters: weight (out, in), bias (out,).
    bound = 1.0 / math.sqrt(big_model_dim)
    weight = jax.random.uniform(
        k_w, (big_model_dim, big_model_dim), jnp.float32, -bound, bound
    )
    bias = jax.random.uniform(k_b, (big_model_dim,), jnp.float32, -bound, bound)

    x = jax.random.normal(k_x, (batch, seq, big_model_dim), jnp.float32)

    # One-time parameter prep (at load time, NOT per forward): (out,in)->(in,out).
    w_kn = jnp.asarray(weight.T)

    # Reference (same semantics as PyTorch nn.Linear).
    y_ref = x @ weight.T + bias

    # 1) Default tiling (single large tile at this toy size).
    y = jax.block_until_ready(big_linear_projection(x, w_kn, bias))
    assert y.shape == (batch, seq, big_model_dim)
    assert jnp.allclose(y, y_ref, atol=1e-4, rtol=1e-4)

    # 2) Small tiles to exercise the full 3-D grid (M/N/K tiling, accumulator,
    #    last-step bias add) plus M padding.
    y_tiled = jax.block_until_ready(
        big_linear_projection(x, w_kn, bias, tm=64, tn=128, tk=128)
    )
    assert jnp.allclose(y_tiled, y_ref, atol=1e-4, rtol=1e-4)

    # 3) bf16 compute path (f32 accumulation), looser tolerance.
    y_bf16 = jax.block_until_ready(
        big_linear_projection(x, w_kn, bias, compute_dtype=jnp.bfloat16)
    )
    assert jnp.allclose(y_bf16, y_ref, atol=5e-2, rtol=5e-2)

    print("KERNEL_OK")
</pallas_src>

<mosaic_0001>
module attributes {stable_mosaic.version = 11 : i64} {
  func.func @_linear_kernel(%arg0: i32, %arg1: i32, %arg2: i32, %arg3: memref<104x256xf32, #tpu.memory_space<vmem>>, %arg4: memref<256x256xf32, #tpu.memory_space<vmem>>, %arg5: memref<1x256xf32, #tpu.memory_space<vmem>>, %arg6: memref<104x256xf32, #tpu.memory_space<vmem>>, %arg7: memref<104x256xf32, #tpu.memory_space<vmem>>) attributes {dimension_semantics = [#tpu.dimension_semantics<parallel>, #tpu.dimension_semantics<parallel>, #tpu.dimension_semantics<arbitrary>], iteration_bounds = array<i64: 1, 1, 1>, scalar_prefetch = 0 : i64, scratch_operands = 1 : i64, tpu.core_type = #tpu.core_type<tc>, window_params = [{transform_indices = @transform_0, window_bounds = array<i64: 104, 256>}, {transform_indices = @transform_1, window_bounds = array<i64: 256, 256>}, {transform_indices = @transform_2, window_bounds = array<i64: 1, 256>}, {transform_indices = @transform_3, window_bounds = array<i64: 104, 256>}]} {
    %c0_i32 = arith.constant 0 : i32
    %0 = arith.cmpi eq, %arg2, %c0_i32 : i32
    %1 = arith.extui %0 : i1 to i32
    %c0_i32_0 = arith.constant 0 : i32
    %2 = arith.cmpi ne, %1, %c0_i32_0 : i32
    scf.if %2 {
      %cst_10 = arith.constant 0.000000e+00 : f32
      %12 = vector.broadcast %cst_10 : f32 to vector<104x256xf32>
      %c0_11 = arith.constant 0 : index
      %c0_12 = arith.constant 0 : index
      %13 = vector.load %arg7[%c0_11, %c0_12] : memref<104x256xf32, #tpu.memory_space<vmem>>, vector<104x256xf32>
      tpu.vector_store %arg7[%c0_11, %c0_12], %12 {strides = array<i32>} : memref<104x256xf32, #tpu.memory_space<vmem>>, vector<104x256xf32>,
    } else {
    }
    %c0 = arith.constant 0 : index
    %c0_1 = arith.constant 0 : index
    %3 = vector.load %arg7[%c0, %c0_1] : memref<104x256xf32, #tpu.memory_space<vmem>>, vector<104x256xf32>
    %c0_2 = arith.constant 0 : index
    %c0_3 = arith.constant 0 : index
    %4 = vector.load %arg3[%c0_2, %c0_3] : memref<104x256xf32, #tpu.memory_space<vmem>>, vector<104x256xf32>
    %c0_4 = arith.constant 0 : index
    %c0_5 = arith.constant 0 : index
    %5 = vector.load %arg4[%c0_4, %c0_5] : memref<256x256xf32, #tpu.memory_space<vmem>>, vector<256x256xf32>
    %cst = arith.constant dense<0.000000e+00> : vector<104x256xf32>
    %6 = tpu.matmul %4, %5, %cst {dimension_numbers = #tpu.dot_dimension_numbers<[1], [0], [0], [1], [0, 0, 1, 1], [], []>} : vector<104x256xf32>, vector<256x256xf32>, vector<104x256xf32> -> vector<104x256xf32>
    %7 = arith.addf %3, %6 : vector<104x256xf32>
    %c0_6 = arith.constant 0 : index
    %c0_7 = arith.constant 0 : index
    %8 = vector.load %arg7[%c0_6, %c0_7] : memref<104x256xf32, #tpu.memory_space<vmem>>, vector<104x256xf32>
    tpu.vector_store %arg7[%c0_6, %c0_7], %7 {strides = array<i32>} : memref<104x256xf32, #tpu.memory_space<vmem>>, vector<104x256xf32>,
    %c0_i32_8 = arith.constant 0 : i32
    %9 = arith.cmpi eq, %arg2, %c0_i32_8 : i32
    %10 = arith.extui %9 : i1 to i32
    %c0_i32_9 = arith.constant 0 : i32
    %11 = arith.cmpi ne, %10, %c0_i32_9 : i32
    scf.if %11 {
      %c0_10 = arith.constant 0 : index
      %c0_11 = arith.constant 0 : index
      %12 = vector.load %arg7[%c0_10, %c0_11] : memref<104x256xf32, #tpu.memory_space<vmem>>, vector<104x256xf32>
      %c0_12 = arith.constant 0 : index
      %c0_13 = arith.constant 0 : index
      %13 = vector.load %arg5[%c0_12, %c0_13] : memref<1x256xf32, #tpu.memory_space<vmem>>, vector<1x256xf32>
      %14 = vector.broadcast %13 : vector<1x256xf32> to vector<104x256xf32>
      %15 = arith.addf %12, %14 : vector<104x256xf32>
      %c0_14 = arith.constant 0 : index
      %c0_15 = arith.constant 0 : index
      %16 = vector.load %arg6[%c0_14, %c0_15] : memref<104x256xf32, #tpu.memory_space<vmem>>, vector<104x256xf32>
      tpu.vector_store %arg6[%c0_14, %c0_15], %15 {strides = array<i32>} : memref<104x256xf32, #tpu.memory_space<vmem>>, vector<104x256xf32>,
    } else {
    }
    return
  }
  func.func @transform_0(%arg0: i32, %arg1: i32, %arg2: i32) -> (i32, i32) {
    %c0_i32 = arith.constant 0 : i32
    return %arg0, %arg2 : i32, i32
  }
  func.func @transform_1(%arg0: i32, %arg1: i32, %arg2: i32) -> (i32, i32) {
    %c0_i32 = arith.constant 0 : i32
    return %arg2, %arg1 : i32, i32
  }
  func.func @transform_2(%arg0: i32, %arg1: i32, %arg2: i32) -> (i32, i32) {
    %c0_i32 = arith.constant 0 : i32
    %c0_i32_0 = arith.constant 0 : i32
    return %c0_i32, %arg1 : i32, i32
  }
  func.func @transform_3(%arg0: i32, %arg1: i32, %arg2: i32) -> (i32, i32) {
    %c0_i32 = arith.constant 0 : i32
    return %arg0, %arg1 : i32, i32
  }
}

</mosaic_0001>

<bundles_post_ra>
// kernel: tpu_custom_call.1
= control target key start
LH: loop header
LB: loop body
LE: loop exit
PB: predicated region body
PF: predicated region fallthrough
CT: control target
= control target key end

     0   :  { %8 = vsyncpa [#allocation4], 0  ;;  %s706_s0 = inlined_call_operand.hbm [shape: f32[104,256], index: 0, kind: input, shape index: {}]   ;;  %s707_s1 = inlined_call_operand.hbm [shape: f32[256,256], index: 1, kind: input, shape index: {}]   ;;  %s708_s2 = inlined_call_operand.vmem [shape: f32[1,256], index: 2, kind: input, shape index: {}]   ;;  %s709_s3 = inlined_call_operand.hbm [shape: f32[104,256], index: 3, kind: output, shape index: {}]  }
   0x1   :  { %9 = vsyncpa [#allocation7], 0 }
   0x2   :  { %10 = vsyncpa [#allocation5], 0  ;;  %s630_s12 = smov [#allocation3]  }
   0x3   :  { %s16_s13 = sshll.u32 %s630_s12, 4  ;;  %s17_s13 = int_to_ptr.vmem [resolvable:$true] %s16_s13 }
   0x4   :  { %s572_s14 = scalar_lea.vmem %s17_s13, 3328  ;;  %p577_p1 = scmp.lt.s32.totalorder %s17_s13, %s17_s13 }
   0x5   :  { %p573_p0 = scmp.ne.s32.totalorder %s17_s13, %s572_s14  ;;  %p578_p2 = scmp.lt.s32.totalorder %s572_s14, %s572_s14 }
   0x7   :  { %p579_p3 = por %p578_p2, %p577_p1 }
   0x9   :  { %p580_p4 = pnand %p579_p3, %p573_p0 }
   0xb   :  { %583 = shalt.err (!%p580_p4)
}
   0xc   :  { %s631_s15 = smov 256   ;;  %s632_s16 = smov 16  }
   0xd   :  { %22 = dma.hbm_to_vmem [thread:$0]  %s706_s0, 3328, %s17_s13, [#allocation4], %s631_s15, %s631_s15, %s632_s16  }
   0xe   :  { %s633_s19 = smov [#allocation6]  }
   0xf   :  { %s28_s20 = sshll.u32 %s633_s19, 4  ;;  %s29_s20 = int_to_ptr.vmem [resolvable:$true] %s28_s20 }
  0x10   :  { %s592_s21 = scalar_lea.vmem %s29_s20, 8192  ;;  %p597_p6 = scmp.lt.s32.totalorder %s29_s20, %s29_s20 }
  0x11   :  { %p593_p5 = scmp.ne.s32.totalorder %s29_s20, %s592_s21  ;;  %p598_p7 = scmp.lt.s32.totalorder %s592_s21, %s592_s21 }
  0x13   :  { %p599_p8 = por %p598_p7, %p597_p6 }
  0x15   :  { %p600_p9 = pnand %p599_p8, %p593_p5 }
  0x17   :  { %603 = shalt.err (!%p600_p9)
}
  0x18   :  { %34 = dma.hbm_to_vmem [thread:$0]  %s707_s1, 8192, %s29_s20, [#allocation7], %s631_s15, %s631_s15, %s632_s16  }
  0x19   :  { %624 = dma.done.wait [#allocation4], 3328  }
  0x1a   :  { %625 = vsyncadd [#allocation4], 4294963968 }
  0x1b   :  { %626 = dma.done.wait [#allocation7], 8192  }
  0x1c   :  { %627 = vsyncadd [#allocation7], 4294959104  ;;  %v156_v0 = vld [vmem:[#allocation6 + $0xf8] sm:$0xff]  ;;  %v155_v1 = vld [vmem:[#allocation6 + $0xf0] sm:$0xff] }
  0x1d   :  { %v154_v2 = vld [vmem:[#allocation6 + $0xe8] sm:$0xff]  ;;  %189 = vmatprep.subr.mxu0 %v156_v0  ;;  %495 = vmatprep.subr.mxu1 %v156_v0  ;;  %v153_v3 = vld [vmem:[#allocation6 + $0xe0] sm:$0xff]  ;;  %v152_v4 = vld [vmem:[#allocation6 + $0xd8] sm:$0xff] }
  0x1e   :  { %190 = vmatpush1.msra.mxu0 %v155_v1  ;;  %527 = vmatpush1.msra.mxu1 %v155_v1  ;;  %v151_v5 = vld [vmem:[#allocation6 + $0xd0] sm:$0xff]  ;;  %v150_v6 = vld [vmem:[#allocation6 + $0xc8] sm:$0xff]  ;;  %v149_v7 = vld [vmem:[#allocation6 + $0xc0] sm:$0xff] }
  0x1f   :  { %191 = vmatprep.subr.mxu0 %v154_v2  ;;  %496 = vmatprep.subr.mxu1 %v154_v2  ;;  %v148_v8 = vld [vmem:[#allocation6 + $0xb8] sm:$0xff]  ;;  %v147_v9 = vld [vmem:[#allocation6 + $0xb0] sm:$0xff]  ;;  %v146_v10 = vld [vmem:[#allocation6 + $0xa8] sm:$0xff] }
  0x20   :  { %192 = vmatpush1.msra.mxu0 %v153_v3  ;;  %528 = vmatpush1.msra.mxu1 %v153_v3  ;;  %v145_v11 = vld [vmem:[#allocation6 + $0xa0] sm:$0xff]  ;;  %v144_v12 = vld [vmem:[#allocation6 + $0x98] sm:$0xff]  ;;  %v143_v13 = vld [vmem:[#allocation6 + $0x90] sm:$0xff] }
  0x21   :  { %193 = vmatprep.subr.mxu0 %v152_v4  ;;  %497 = vmatprep.subr.mxu1 %v152_v4  ;;  %v142_v14 = vld [vmem:[#allocation6 + $0x88] sm:$0xff]  ;;  %v141_v15 = vld [vmem:[#allocation6 + $0x80] sm:$0xff]  ;;  %v140_v16 = vld [vmem:[#allocation6 + $0x78] sm:$0xff] }
  0x22   :  { %194 = vmatpush1.msra.mxu0 %v151_v5  ;;  %529 = vmatpush1.msra.mxu1 %v151_v5  ;;  %v139_v17 = vld [vmem:[#allocation6 + $0x70] sm:$0xff]  ;;  %v138_v18 = vld [vmem:[#allocation6 + $0x68] sm:$0xff]  ;;  %v137_v19 = vld [vmem:[#allocation6 + $0x60] sm:$0xff] }
  0x23   :  { %195 = vmatprep.subr.mxu0 %v150_v6  ;;  %498 = vmatprep.subr.mxu1 %v150_v6  ;;  %v136_v20 = vld [vmem:[#allocation6 + $0x58] sm:$0xff]  ;;  %v135_v21 = vld [vmem:[#allocation6 + $0x50] sm:$0xff]  ;;  %v134_v22 = vld [vmem:[#allocation6 + $0x48] sm:$0xff] }
  0x24   :  { %196 = vmatpush1.msra.mxu0 %v149_v7  ;;  %530 = vmatpush1.msra.mxu1 %v149_v7  ;;  %v133_v23 = vld [vmem:[#allocation6 + $0x40] sm:$0xff]  ;;  %v132_v24 = vld [vmem:[#allocation6 + $0x38] sm:$0xff]  ;;  %v131_v25 = vld [vmem:[#allocation6 + $0x30] sm:$0xff] }
  0x25   :  { %197 = vmatprep.subr.mxu0 %v148_v8  ;;  %499 = vmatprep.subr.mxu1 %v148_v8  ;;  %v130_v26 = vld [vmem:[#allocation6 + $0x28] sm:$0xff]  ;;  %v129_v27 = vld [vmem:[#allocation6 + $0x20] sm:$0xff]  ;;  %v128_v28 = vld [vmem:[#allocation6 + $0x18] sm:$0xff] }
  0x26   :  { %198 = vmatpush1.msra.mxu0 %v147_v9  ;;  %531 = vmatpush1.msra.mxu1 %v147_v9  ;;  %v127_v29 = vld [vmem:[#allocation6 + $0x10] sm:$0xff]  ;;  %v126_v30 = vld [vmem:[#allocation6 + $0x8] sm:$0xff]  ;;  %v125_v31 = vld [vmem:[#allocation6] sm:$0xff] }
  0x27   :  { %199 = vmatprep.subr.mxu0 %v146_v10  ;;  %500 = vmatprep.subr.mxu1 %v146_v10  ;;  %v188_v32 = vld [vmem:[#allocation6 + $0x1f8] sm:$0xff]  ;;  %v187_v33 = vld [vmem:[#allocation6 + $0x1f0] sm:$0xff]  ;;  %v186_v34 = vld [vmem:[#allocation6 + $0x1e8] sm:$0xff] }
  0x28   :  { %200 = vmatpush1.msra.mxu0 %v145_v11  ;;  %532 = vmatpush1.msra.mxu1 %v145_v11  ;;  %v185_v35 = vld [vmem:[#allocation6 + $0x1e0] sm:$0xff]  ;;  %v184_v36 = vld [vmem:[#allocation6 + $0x1d8] sm:$0xff]  ;;  %v183_v37 = vld [vmem:[#allocation6 + $0x1d0] sm:$0xff] }
  0x29   :  { %201 = vmatprep.subr.mxu0 %v144_v12  ;;  %501 = vmatprep.subr.mxu1 %v144_v12  ;;  %v182_v38 = vld [vmem:[#allocation6 + $0x1c8] sm:$0xff]  ;;  %v181_v39 = vld [vmem:[#allocation6 + $0x1c0] sm:$0xff]  ;;  %v180_v40 = vld [vmem:[#allocation6 + $0x1b8] sm:$0xff] }
  0x2a   :  { %202 = vmatpush1.msra.mxu0 %v143_v13  ;;  %533 = vmatpush1.msra.mxu1 %v143_v13  ;;  %v179_v41 = vld [vmem:[#allocation6 + $0x1b0] sm:$0xff]  ;;  %v178_v42 = vld [vmem:[#allocation6 + $0x1a8] sm:$0xff]  ;;  %v177_v43 = vld [vmem:[#allocation6 + $0x1a0] sm:$0xff] }
  0x2b   :  { %203 = vmatprep.subr.mxu0 %v142_v14  ;;  %502 = vmatprep.subr.mxu1 %v142_v14  ;;  %v176_v44 = vld [vmem:[#allocation6 + $0x198] sm:$0xff]  ;;  %v175_v45 = vld [vmem:[#allocation6 + $0x190] sm:$0xff]  ;;  %v174_v46 = vld [vmem:[#allocation6 + $0x188] sm:$0xff] }
  0x2c   :  { %204 = vmatpush1.msra.mxu0 %v141_v15  ;;  %534 = vmatpush1.msra.mxu1 %v141_v15  ;;  %v173_v47 = vld [vmem:[#allocation6 + $0x180] sm:$0xff]  ;;  %v172_v48 = vld [vmem:[#allocation6 + $0x178] sm:$0xff]  ;;  %v171_v49 = vld [vmem:[#allocation6 + $0x170] sm:$0xff] }
  0x2d   :  { %205 = vmatprep.subr.mxu0 %v140_v16  ;;  %503 = vmatprep.subr.mxu1 %v140_v16  ;;  %v170_v50 = vld [vmem:[#allocation6 + $0x168] sm:$0xff]  ;;  %v169_v51 = vld [vmem:[#allocation6 + $0x160] sm:$0xff]  ;;  %v168_v52 = vld [vmem:[#allocation6 + $0x158] sm:$0xff] }
  0x2e   :  { %206 = vmatpush1.msra.mxu0 %v139_v17  ;;  %535 = vmatpush1.msra.mxu1 %v139_v17  ;;  %v167_v53 = vld [vmem:[#allocation6 + $0x150] sm:$0xff]  ;;  %v166_v54 = vld [vmem:[#allocation6 + $0x148] sm:$0xff]  ;;  %v165_v55 = vld [vmem:[#allocation6 + $0x140] sm:$0xff] }
  0x2f   :  { %207 = vmatprep.subr.mxu0 %v138_v18  ;;  %504 = vmatprep.subr.mxu1 %v138_v18  ;;  %v164_v56 = vld [vmem:[#allocation6 + $0x138] sm:$0xff]  ;;  %v163_v57 = vld [vmem:[#allocation6 + $0x130] sm:$0xff]  ;;  %v162_v58 = vld [vmem:[#allocation6 + $0x128] sm:$0xff] }
  0x30   :  { %208 = vmatpush1.msra.mxu0 %v137_v19  ;;  %536 = vmatpush1.msra.mxu1 %v137_v19  ;;  %v161_v59 = vld [vmem:[#allocation6 + $0x120] sm:$0xff]  ;;  %v160_v60 = vld [vmem:[#allocation6 + $0x118] sm:$0xff]  ;;  %v159_v61 = vld [vmem:[#allocation6 + $0x110] sm:$0xff] }
  0x31   :  { %209 = vmatprep.subr.mxu0 %v136_v20  ;;  %505 = vmatprep.subr.mxu1 %v136_v20  ;;  %v158_v62 = vld [vmem:[#allocation6 + $0x108] sm:$0xff]  ;;  %v100_v63 = vld [vmem:[#allocation3 + $0x8] sm:$0xff]  ;;  %v157_v0 = vld [vmem:[#allocation6 + $0x100] sm:$0xff] }
  0x32   :  { %210 = vmatpush1.msra.mxu0 %v135_v21  ;;  %537 = vmatpush1.msra.mxu1 %v135_v21  ;;  %v99_v1 = vld [vmem:[#allocation3] sm:$0xff]  ;;  %v114_v2 = vld [vmem:[#allocation3 + $0x78] sm:$0xff]  ;;  %v113_v4 = vld [vmem:[#allocation3 + $0x70] sm:$0xff] }
  0x33   :  { %211 = vmatprep.subr.mxu0 %v134_v22  ;;  %506 = vmatprep.subr.mxu1 %v134_v22  ;;  %v102_v3 = vld [vmem:[#allocation3 + $0x18] sm:$0xff]  ;;  %v116_v5 = vld [vmem:[#allocation3 + $0x88] sm:$0xff]  ;;  %v101_v6 = vld [vmem:[#allocation3 + $0x10] sm:$0xff] }
  0x34   :  { %212 = vmatpush1.msra.mxu0 %v133_v23  ;;  %538 = vmatpush1.msra.mxu1 %v133_v23  ;;  %v104_v7 = vld [vmem:[#allocation3 + $0x28] sm:$0xff]  ;;  %v115_v8 = vld [vmem:[#allocation3 + $0x80] sm:$0xff]  ;;  %v118_v9 = vld [vmem:[#allocation3 + $0x98] sm:$0xff] }
  0x35   :  { %213 = vmatprep.subr.mxu0 %v132_v24  ;;  %507 = vmatprep.subr.mxu1 %v132_v24  ;;  %v103_v10 = vld [vmem:[#allocation3 + $0x20] sm:$0xff]  ;;  %v106_v11 = vld [vmem:[#allocation3 + $0x38] sm:$0xff]  ;;  %v117_v12 = vld [vmem:[#allocation3 + $0x90] sm:$0xff] }
  0x36   :  { %214 = vmatpush1.msra.mxu0 %v131_v25  ;;  %539 = vmatpush1.msra.mxu1 %v131_v25  ;;  %v120_v13 = vld [vmem:[#allocation3 + $0xa8] sm:$0xff]  ;;  %v105_v14 = vld [vmem:[#allocation3 + $0x30] sm:$0xff]  ;;  %v119_v16 = vld [vmem:[#allocation3 + $0xa0] sm:$0xff] }
  0x37   :  { %215 = vmatprep.subr.mxu0 %v130_v26  ;;  %508 = vmatprep.subr.mxu1 %v130_v26  ;;  %v108_v15 = vld [vmem:[#allocation3 + $0x48] sm:$0xff]  ;;  %v122_v17 = vld [vmem:[#allocation3 + $0xb8] sm:$0xff]  ;;  %v107_v18 = vld [vmem:[#allocation3 + $0x40] sm:$0xff]  ;;  %v415_v26 = vlaneseq }
  0x38   :  { %216 = vmatpush1.msra.mxu0 %v129_v27  ;;  %540 = vmatpush1.msra.mxu1 %v129_v27  ;;  %v110_v19 = vld [vmem:[#allocation3 + $0x58] sm:$0xff]  ;;  %v121_v20 = vld [vmem:[#allocation3 + $0xb0] sm:$0xff]  ;;  %v124_v21 = vld [vmem:[#allocation3 + $0xc8] sm:$0xff] }
  0x39   :  { %217 = vmatprep.subr.mxu0 %v128_v28  ;;  %509 = vmatprep.subr.mxu1 %v128_v28  ;;  %v109_v22 = vld [vmem:[#allocation3 + $0x50] sm:$0xff]  ;;  %v112_v23 = vld [vmem:[#allocation3 + $0x68] sm:$0xff]  ;;  %v123_v24 = vld [vmem:[#allocation3 + $0xc0] sm:$0xff]  ;;  %v416_v27 = vshrl.u32 %v415_v26, 7 }
  0x3a   :  { %218 = vmatpush1.msra.mxu0 %v127_v29  ;;  %541 = vmatpush1.msra.mxu1 %v127_v29  ;;  %v111_v25 = vld [vmem:[#allocation3 + $0x60] sm:$0xff] }
  0x3b   :  { %219 = vmatprep.subr.mxu0 %v126_v30  ;;  %510 = vmatprep.subr.mxu1 %v126_v30  ;;  %v417_v28 = vsub.s32 0, %v416_v27  ;;  %v413_v29 = vld [vmem:[%s708_s2] sm:$0x3]  ;;  %v421_v30 = vsub.s32 1, %v416_v27  ;;  %s634_s2 = smov [#allocation8]  }
  0x3c   :  { %220 = vmatpush1.msra.mxu0 %v125_v31  ;;  %542 = vmatpush1.msra.mxu1 %v125_v31  ;;  %s482_s24 = sshll.u32 %s634_s2, 4  ;;  %s483_s24 = int_to_ptr.vmem [resolvable:$true] %s482_s24 }
  0x3d   :  { %221 = vmatprep.subr.mxu0 %v188_v32  ;;  %511 = vmatprep.subr.mxu1 %v188_v32  ;;  %v670_v31 = vrot.slane %v413_v29, %v417_v28  ;;  %v672_v32 = vrot.slane %v413_v29, %v421_v30  ;;  %s604_s25 = scalar_lea.vmem %s483_s24, 3328  ;;  %p609_p11 = scmp.lt.s32.totalorder %s483_s24, %s483_s24 }
  0x3e   :  { %222 = vmatpush2.msra.mxu0 %v187_v33  ;;  %543 = vmatpush2.msra.mxu1 %v187_v33  ;;  %p605_p10 = scmp.ne.s32.totalorder %s483_s24, %s604_s25  ;;  %p610_p12 = scmp.lt.s32.totalorder %s604_s25, %s604_s25 }
  0x3f   :  { %223 = vmatprep.subr.mxu0 %v186_v34  ;;  %512 = vmatprep.subr.mxu1 %v186_v34 }
  0x40   :  { %224 = vmatpush2.msra.mxu0 %v185_v35  ;;  %544 = vmatpush2.msra.mxu1 %v185_v35  ;;  %p611_p13 = por %p610_p12, %p609_p11 }
  0x41   :  { %225 = vmatprep.subr.mxu0 %v184_v36  ;;  %513 = vmatprep.subr.mxu1 %v184_v36 }
  0x42   :  { %226 = vmatpush2.msra.mxu0 %v183_v37  ;;  %545 = vmatpush2.msra.mxu1 %v183_v37  ;;  %p612_p0 = pnand %p611_p13, %p605_p10 }
  0x43   :  { %227 = vmatprep.subr.mxu0 %v182_v38  ;;  %514 = vmatprep.subr.mxu1 %v182_v38 }
  0x44   :  { %228 = vmatpush2.msra.mxu0 %v181_v39  ;;  %546 = vmatpush2.msra.mxu1 %v181_v39 }
  0x45   :  { %229 = vmatprep.subr.mxu0 %v180_v40  ;;  %515 = vmatprep.subr.mxu1 %v180_v40 }
  0x46   :  { %230 = vmatpush2.msra.mxu0 %v179_v41  ;;  %547 = vmatpush2.msra.mxu1 %v179_v41 }
  0x47   :  { %231 = vmatprep.subr.mxu0 %v178_v42  ;;  %516 = vmatprep.subr.mxu1 %v178_v42 }
  0x48   :  { %232 = vmatpush2.msra.mxu0 %v177_v43  ;;  %548 = vmatpush2.msra.mxu1 %v177_v43 }
  0x49   :  { %233 = vmatprep.subr.mxu0 %v176_v44  ;;  %517 = vmatprep.subr.mxu1 %v176_v44 }
  0x4a   :  { %234 = vmatpush2.msra.mxu0 %v175_v45  ;;  %549 = vmatpush2.msra.mxu1 %v175_v45 }
  0x4b   :  { %235 = vmatprep.subr.mxu0 %v174_v46  ;;  %518 = vmatprep.subr.mxu1 %v174_v46 }
  0x4c   :  { %236 = vmatpush2.msra.mxu0 %v173_v47  ;;  %550 = vmatpush2.msra.mxu1 %v173_v47 }
  0x4d   :  { %237 = vmatprep.subr.mxu0 %v172_v48  ;;  %519 = vmatprep.subr.mxu1 %v172_v48 }
  0x4e   :  { %238 = vmatpush2.msra.mxu0 %v171_v49  ;;  %551 = vmatpush2.msra.mxu1 %v171_v49 }
  0x4f   :  { %239 = vmatprep.subr.mxu0 %v170_v50  ;;  %520 = vmatprep.subr.mxu1 %v170_v50 }
  0x50   :  { %240 = vmatpush2.msra.mxu0 %v169_v51  ;;  %552 = vmatpush2.msra.mxu1 %v169_v51 }
  0x51   :  { %241 = vmatprep.subr.mxu0 %v168_v52  ;;  %521 = vmatprep.subr.mxu1 %v168_v52 }
  0x52   :  { %242 = vmatpush2.msra.mxu0 %v167_v53  ;;  %553 = vmatpush2.msra.mxu1 %v167_v53 }
  0x53   :  { %243 = vmatprep.subr.mxu0 %v166_v54  ;;  %522 = vmatprep.subr.mxu1 %v166_v54 }
  0x54   :  { %244 = vmatpush2.msra.mxu0 %v165_v55  ;;  %554 = vmatpush2.msra.mxu1 %v165_v55 }
  0x55   :  { %245 = vmatprep.subr.mxu0 %v164_v56  ;;  %523 = vmatprep.subr.mxu1 %v164_v56 }
  0x56   :  { %246 = vmatpush2.msra.mxu0 %v163_v57  ;;  %555 = vmatpush2.msra.mxu1 %v163_v57 }
  0x57   :  { %247 = vmatprep.subr.mxu0 %v162_v58  ;;  %524 = vmatprep.subr.mxu1 %v162_v58 }
  0x58   :  { %248 = vmatpush2.msra.mxu0 %v161_v59  ;;  %556 = vmatpush2.msra.mxu1 %v161_v59 }
  0x59   :  { %249 = vmatprep.subr.mxu0 %v160_v60  ;;  %525 = vmatprep.subr.mxu1 %v160_v60 }
  0x5a   :  { %250 = vmatpush2.msra.mxu0 %v159_v61  ;;  %557 = vmatpush2.msra.mxu1 %v159_v61 }
  0x5b   :  { %251 = vmatprep.subr.mxu0 %v158_v62  ;;  %253 = vmatprep.mubr.f32.mxu0 %v100_v63 }
  0x5c   :  { %252 = vmatpush2.msra.mxu0 %v157_v0  ;;  %526 = vmatprep.subr.mxu1 %v158_v62 }
  0x5d   :  { %254 = vmatmul.mubr.f32.vlgmr.msra.gmra.mxu0 %v99_v1  ;;  %558 = vmatpush2.msra.mxu1 %v157_v0 }
  0x5e   :  { %295 = vmatprep.mubr.f32.mxu1 %v114_v2  ;;  %259 = vmatprep.mubr.f32.mxu0 %v102_v3 }
  0x5f   :  { %296 = vmatmul.mubr.f32.vlgmr.msra.gmra.mxu1 %v113_v4 }
  0x60   :  { %301 = vmatprep.mubr.f32.mxu1 %v116_v5 }
  0x61   :  { %260 = vmatmul.mubr.f32.gmra.mxu0 %v101_v6 }
  0x62   :  { %265 = vmatprep.mubr.f32.mxu0 %v104_v7 }
  0x63   :  { %302 = vmatmul.mubr.f32.gmra.mxu1 %v115_v8 }
  0x64   :  { %307 = vmatprep.mubr.f32.mxu1 %v118_v9 }
  0x65   :  { %266 = vmatmul.mubr.f32.gmra.mxu0 %v103_v10 }
  0x66   :  { %271 = vmatprep.mubr.f32.mxu0 %v106_v11 }
  0x67   :  { %308 = vmatmul.mubr.f32.gmra.mxu1 %v117_v12 }
  0x68   :  { %313 = vmatprep.mubr.f32.mxu1 %v120_v13 }
  0x69   :  { %272 = vmatmul.mubr.f32.gmra.mxu0 %v105_v14 }
  0x6a   :  { %277 = vmatprep.mubr.f32.mxu0 %v108_v15 }
  0x6b   :  { %314 = vmatmul.mubr.f32.gmra.mxu1 %v119_v16 }
  0x6c   :  { %319 = vmatprep.mubr.f32.mxu1 %v122_v17 }
  0x6d   :  { %278 = vmatmul.mubr.f32.gmra.mxu0 %v107_v18 }
  0x6e   :  { %283 = vmatprep.mubr.f32.mxu0 %v110_v19 }
  0x6f   :  { %320 = vmatmul.mubr.f32.gmra.mxu1 %v121_v20 }
  0x70   :  { %325 = vmatprep.mubr.f32.mxu1 %v124_v21 }
  0x71   :  { %284 = vmatmul.mubr.f32.gmra.mxu0 %v109_v22 }
  0x72   :  { %289 = vmatprep.mubr.f32.mxu0 %v112_v23 }
  0x73   :  { %326 = vmatmul.mubr.f32.gmra.mxu1 %v123_v24 }
  0x75   :  { %290 = vmatmul.mubr.f32.gmra.mxu0 %v111_v25 }
 0x11d   :  { %v255_v33 = vpop.f32.mrf.mxu0 }
 0x11e   :  { %v425_v34 = vadd.f32 %v670_v31, %v255_v33 }
 0x11f   :  { %v257_v35 = vpop.f32.mrf.mxu0  ;;  %v297_v36 = vpop.f32.mrf.mxu1 }
 0x120   :  { %451 = vst [vmem:[#allocation8] sm:$0xff] %v425_v34  ;;  %v426_v37 = vadd.f32 %v672_v32, %v257_v35  ;;  %v439_v38 = vadd.f32 %v670_v31, %v297_v36 }
 0x121   :  { %v261_v39 = vpop.f32.mrf.mxu0  ;;  %v299_v40 = vpop.f32.mrf.mxu1 }
 0x122   :  { %452 = vst [vmem:[#allocation8 + $0x8] sm:$0xff] %v426_v37  ;;  %465 = vst [vmem:[#allocation8 + $0x70] sm:$0xff] %v439_v38  ;;  %v427_v41 = vadd.f32 %v670_v31, %v261_v39  ;;  %v440_v42 = vadd.f32 %v672_v32, %v299_v40 }
 0x123   :  { %v263_v43 = vpop.f32.mrf.mxu0  ;;  %v303_v44 = vpop.f32.mrf.mxu1 }
 0x124   :  { %453 = vst [vmem:[#allocation8 + $0x10] sm:$0xff] %v427_v41  ;;  %466 = vst [vmem:[#allocation8 + $0x78] sm:$0xff] %v440_v42  ;;  %v428_v45 = vadd.f32 %v672_v32, %v263_v43  ;;  %v441_v46 = vadd.f32 %v670_v31, %v303_v44 }
 0x125   :  { %v267_v47 = vpop.f32.mrf.mxu0  ;;  %v305_v48 = vpop.f32.mrf.mxu1 }
 0x126   :  { %454 = vst [vmem:[#allocation8 + $0x18] sm:$0xff] %v428_v45  ;;  %467 = vst [vmem:[#allocation8 + $0x80] sm:$0xff] %v441_v46  ;;  %v429_v49 = vadd.f32 %v670_v31, %v267_v47  ;;  %v442_v50 = vadd.f32 %v672_v32, %v305_v48 }
 0x127   :  { %v269_v51 = vpop.f32.mrf.mxu0  ;;  %v309_v52 = vpop.f32.mrf.mxu1 }
 0x128   :  { %455 = vst [vmem:[#allocation8 + $0x20] sm:$0xff] %v429_v49  ;;  %468 = vst [vmem:[#allocation8 + $0x88] sm:$0xff] %v442_v50  ;;  %v430_v53 = vadd.f32 %v672_v32, %v269_v51  ;;  %v443_v54 = vadd.f32 %v670_v31, %v309_v52 }
 0x129   :  { %v273_v55 = vpop.f32.mrf.mxu0  ;;  %v311_v56 = vpop.f32.mrf.mxu1 }
 0x12a   :  { %456 = vst [vmem:[#allocation8 + $0x28] sm:$0xff] %v430_v53  ;;  %469 = vst [vmem:[#allocation8 + $0x90] sm:$0xff] %v443_v54  ;;  %v431_v57 = vadd.f32 %v670_v31, %v273_v55  ;;  %v444_v58 = vadd.f32 %v672_v32, %v311_v56 }
 0x12b   :  { %v275_v59 = vpop.f32.mrf.mxu0  ;;  %v315_v60 = vpop.f32.mrf.mxu1 }
 0x12c   :  { %457 = vst [vmem:[#allocation8 + $0x30] sm:$0xff] %v431_v57  ;;  %470 = vst [vmem:[#allocation8 + $0x98] sm:$0xff] %v444_v58  ;;  %v432_v61 = vadd.f32 %v672_v32, %v275_v59  ;;  %v445_v62 = vadd.f32 %v670_v31, %v315_v60 }
 0x12d   :  { %v279_v63 = vpop.f32.mrf.mxu0  ;;  %v317_v0 = vpop.f32.mrf.mxu1 }
 0x12e   :  { %458 = vst [vmem:[#allocation8 + $0x38] sm:$0xff] %v432_v61  ;;  %471 = vst [vmem:[#allocation8 + $0xa0] sm:$0xff] %v445_v62  ;;  %v433_v1 = vadd.f32 %v670_v31, %v279_v63  ;;  %v446_v2 = vadd.f32 %v672_v32, %v317_v0 }
 0x12f   :  { %v281_v3 = vpop.f32.mrf.mxu0  ;;  %v321_v4 = vpop.f32.mrf.mxu1 }
 0x130   :  { %459 = vst [vmem:[#allocation8 + $0x40] sm:$0xff] %v433_v1  ;;  %472 = vst [vmem:[#allocation8 + $0xa8] sm:$0xff] %v446_v2  ;;  %v434_v5 = vadd.f32 %v672_v32, %v281_v3  ;;  %v447_v6 = vadd.f32 %v670_v31, %v321_v4 }
 0x131   :  { %v285_v7 = vpop.f32.mrf.mxu0  ;;  %v323_v8 = vpop.f32.mrf.mxu1 }
 0x132   :  { %460 = vst [vmem:[#allocation8 + $0x48] sm:$0xff] %v434_v5  ;;  %473 = vst [vmem:[#allocation8 + $0xb0] sm:$0xff] %v447_v6  ;;  %v435_v9 = vadd.f32 %v670_v31, %v285_v7  ;;  %v448_v10 = vadd.f32 %v672_v32, %v323_v8 }
 0x133   :  { %v287_v11 = vpop.f32.mrf.mxu0  ;;  %v327_v12 = vpop.f32.mrf.mxu1 }
 0x134   :  { %461 = vst [vmem:[#allocation8 + $0x50] sm:$0xff] %v435_v9  ;;  %474 = vst [vmem:[#allocation8 + $0xb8] sm:$0xff] %v448_v10  ;;  %v436_v13 = vadd.f32 %v672_v32, %v287_v11  ;;  %v449_v14 = vadd.f32 %v670_v31, %v327_v12 }
 0x135   :  { %v291_v15 = vpop.f32.mrf.mxu0  ;;  %v329_v16 = vpop.f32.mrf.mxu1 }
 0x136   :  { %462 = vst [vmem:[#allocation8 + $0x58] sm:$0xff] %v436_v13  ;;  %475 = vst [vmem:[#allocation8 + $0xc0] sm:$0xff] %v449_v14  ;;  %v437_v17 = vadd.f32 %v670_v31, %v291_v15  ;;  %v450_v18 = vadd.f32 %v672_v32, %v329_v16 }
 0x137   :  { %v293_v19 = vpop.f32.mrf.mxu0 }
 0x138   :  { %463 = vst [vmem:[#allocation8 + $0x60] sm:$0xff] %v437_v17  ;;  %476 = vst [vmem:[#allocation8 + $0xc8] sm:$0xff] %v450_v18  ;;  %v438_v20 = vadd.f32 %v672_v32, %v293_v19 }
 0x13a   :  { %464 = vst [vmem:[#allocation8 + $0x68] sm:$0xff] %v438_v20 }
 0x13b   :  { %615 = shalt.err (!%p612_p0)
}
 0x13c   :  { %488 = dma.vmem_to_hbm [thread:$0]  %s483_s24, 3328, %s709_s3, [#allocation5], %s631_s15, %s631_s15, %s632_s16  }
 0x13d   :  { %628 = dma.done.wait [#allocation5], 3328  }
 0x13e   :  { %629 = vsyncadd [#allocation5], 4294963968 }
 0x13f   :  { %492 = vsyncpa [#allocation4], 1 }
 0x140   :  { %493 = vsyncpa [#allocation7], 1 }
 0x141   :  { %494 = vsyncpa [#allocation5], 1 }

</bundles_post_ra>
